<compile_context>
chip_gen: v7x
topology: tpu7x:2x2x1
jax: 0.10.0
libtpu: 0.0.40
codegen_flags: <defaults>
</compile_context>

<pallas_src>
import functools

import jax
import jax.numpy as jnp
from jax import lax
from jax.experimental import pallas as pl
from jax.experimental.pallas import tpu as pltpu


def _round_up(a: int, m: int) -> int:
    return (a + m - 1) // m * m


def ppo_agent_kernel(x_ref, wb1_ref, wb2_ref, wbh_ref, out_ref,
                     *, in_pad: int, hid_pad: int, n_actions: int):
    # Packed slabs: rows [0, dim_pad) are the (zero-padded) weight matrix,
    # row dim_pad is the bias, remaining rows are zero padding to a multiple
    # of 8.  All slice boundaries below are multiples of 8 (sublane-aligned).
    x = x_ref[...]                                        # (TB, in_pad) f32

    w1 = wb1_ref[:in_pad, :]                              # (in_pad, hid_pad)
    b1 = wb1_ref[in_pad:in_pad + 1, :]                    # (1, hid_pad)
    h1 = jnp.maximum(
        jnp.dot(x, w1, preferred_element_type=jnp.float32) + b1, 0.0)

    w2 = wb2_ref[:hid_pad, :]                             # (hid_pad, hid_pad)
    b2 = wb2_ref[hid_pad:hid_pad + 1, :]                  # (1, hid_pad)
    h2 = jnp.maximum(
        jnp.dot(h1, w2, preferred_element_type=jnp.float32) + b2, 0.0)

    # Fused actor+critic head: lanes 0..n_actions-1 = actor logits,
    # lane n_actions = critic value, remaining lanes = zero padding.
    wh = wbh_ref[:hid_pad, :]                             # (hid_pad, 128)
    bh = wbh_ref[hid_pad:hid_pad + 1, :]                  # (1, 128)
    head = jnp.dot(h2, wh, preferred_element_type=jnp.float32) + bh

    # Softmax restricted to the actor lanes (mask the rest to -inf).
    col = lax.broadcasted_iota(jnp.int32, head.shape, 1)
    is_action = col < n_actions
    masked = jnp.where(is_action, head, -jnp.inf)
    m = jnp.max(masked, axis=-1, keepdims=True)
    e = jnp.exp(masked - m)                               # 0 on non-action lanes
    s = jnp.sum(e, axis=-1, keepdims=True)
    # Exact reciprocal keeps the 1e-5 probs tolerance (approx=True would be
    # a free EUP op but ~2^-12 relative error).
    probs = e * pl.reciprocal(s, approx=False)

    # Lane-dense output slab: probs in action lanes, raw value in lane
    # n_actions, zeros elsewhere (padded lanes of `probs` are already 0).
    out_ref[...] = jnp.where(col == n_actions, head, probs)


def pack_params(params, in_pad: int, hid_pad: int, head_pad: int):
    """Pack (w, b) pairs into sublane-aligned slabs; fuse + lane-pad the heads."""
    input_dim, hidden_dim = params["w1"].shape
    n_actions = params["wa"].shape[1]

    def slab(w, b, rows_pad, cols_pad):
        rows, cols = w.shape
        w = jnp.pad(w, ((0, rows_pad - rows), (0, cols_pad - cols)))
        b = jnp.pad(b, ((0, 0), (0, cols_pad - cols)))
        wb = jnp.concatenate([w, b], axis=0)              # (rows_pad + 1, cols_pad)
        tail = _round_up(rows_pad + 1, 8) - (rows_pad + 1)
        return jnp.pad(wb, ((0, tail), (0, 0)))

    wb1 = slab(params["w1"], params["b1"], in_pad, hid_pad)
    wb2 = slab(params["w2"], params["b2"], hid_pad, hid_pad)

    w_heads = jnp.concatenate([params["wa"], params["wc"]], axis=1)  # (H, A+1)
    b_heads = jnp.concatenate([params["ba"], params["bc"]], axis=1)  # (1, A+1)
    wbh = slab(w_heads, b_heads, hid_pad, head_pad)
    return wb1, wb2, wbh


def ppo_agent_forward(x, params):
    """x: [B, input_dim] f32. Returns (probs [B, n_actions], value [B, 1])."""
    B, input_dim = x.shape
    hidden_dim = params["w1"].shape[1]
    n_actions = params["wa"].shape[1]

    in_pad = _round_up(input_dim, 8)                      # sublane-aligned slices
    hid_pad = _round_up(hidden_dim, 8)
    head_pad = max(128, _round_up(n_actions + 1, 128))    # lane-dense output

    wb1, wb2, wbh = pack_params(params, in_pad, hid_pad, head_pad)

    # Batch tiling: stream x / out through the pipeline, weights stay resident.
    TB = min(256, _round_up(B, 8))
    B_pad = _round_up(B, TB)
    x = jnp.pad(x, ((0, B_pad - B), (0, in_pad - input_dim)))

    kernel = functools.partial(
        ppo_agent_kernel,
        in_pad=in_pad, hid_pad=hid_pad, n_actions=n_actions)

    out = pl.pallas_call(
        kernel,
        out_shape=jax.ShapeDtypeStruct((B_pad, head_pad), jnp.float32),
        grid_spec=pltpu.PrefetchScalarGridSpec(
            num_scalar_prefetch=0,
            grid=(B_pad // TB,),
            in_specs=[
                pl.BlockSpec((TB, in_pad), lambda i: (i, 0)),
                pl.BlockSpec(wb1.shape, lambda i: (0, 0)),   # VMEM-resident
                pl.BlockSpec(wb2.shape, lambda i: (0, 0)),   # VMEM-resident
                pl.BlockSpec(wbh.shape, lambda i: (0, 0)),   # VMEM-resident
            ],
            out_specs=pl.BlockSpec((TB, head_pad), lambda i: (i, 0)),
        ),
        compiler_params=pltpu.CompilerParams(
            dimension_semantics=("parallel",)),   # v7x: shard batch across TCs
    )(x, wb1, wb2, wbh)

    probs = out[:B, :n_actions]
    value = out[:B, n_actions:n_actions + 1]
    return probs, value


def init_params(key, input_dim, hidden_dim, n_actions):
    """Mimics nn.Linear's uniform(-1/sqrt(fan_in), +) init. Weights are [in, out]."""
    def linear(k, fan_in, fan_out):
        kw, kb = jax.random.split(k)
        bound = 1.0 / jnp.sqrt(fan_in)
        w = jax.random.uniform(kw, (fan_in, fan_out), jnp.float32, -bound, bound)
        b = jax.random.uniform(kb, (1, fan_out), jnp.float32, -bound, bound)
        return w, b

    k1, k2, k3, k4 = jax.random.split(key, 4)
    w1, b1 = linear(k1, input_dim, hidden_dim)
    w2, b2 = linear(k2, hidden_dim, hidden_dim)
    wa, ba = linear(k3, hidden_dim, n_actions)
    wc, bc = linear(k4, hidden_dim, 1)
    return {"w1": w1, "b1": b1, "w2": w2, "b2": b2,
            "wa": wa, "ba": ba, "wc": wc, "bc": bc}


def reference_forward(x, p):
    h = jnp.maximum(x @ p["w1"] + p["b1"], 0.0)
    h = jnp.maximum(h @ p["w2"] + p["b2"], 0.0)
    logits = h @ p["wa"] + p["ba"]
    probs = jax.nn.softmax(logits, axis=-1)
    value = h @ p["wc"] + p["bc"]
    return probs, value


if __name__ == "__main__":
    B, input_dim, hidden_dim, n_actions = 8, 16, 32, 8

    key = jax.random.PRNGKey(0)
    kx, kp = jax.random.split(key)
    x = jax.random.normal(kx, (B, input_dim), jnp.float32)
    params = init_params(kp, input_dim, hidden_dim, n_actions)

    probs, value = ppo_agent_forward(x, params)
    probs = jax.block_until_ready(probs)
    value = jax.block_until_ready(value)

    probs_ref, value_ref = reference_forward(x, params)
    assert probs.shape == (B, n_actions) and value.shape == (B, 1)
    assert jnp.allclose(probs, probs_ref, atol=1e-5), "actor mismatch"
    assert jnp.allclose(value, value_ref, atol=1e-5), "critic mismatch"
    assert jnp.allclose(jnp.sum(probs, axis=-1), 1.0, atol=1e-5)

    print("KERNEL_OK")
</pallas_src>

<mosaic_0001>
module attributes {stable_mosaic.version = 11 : i64} {
  func.func @ppo_agent_kernel(%arg0: i32, %arg1: memref<8x16xf32, #tpu.memory_space<vmem>>, %arg2: memref<24x32xf32, #tpu.memory_space<vmem>>, %arg3: memref<40x32xf32, #tpu.memory_space<vmem>>, %arg4: memref<40x128xf32, #tpu.memory_space<vmem>>, %arg5: memref<8x128xf32, #tpu.memory_space<vmem>>) attributes {dimension_semantics = [#tpu.dimension_semantics<parallel>], iteration_bounds = array<i64: 1>, scalar_prefetch = 0 : i64, scratch_operands = 0 : i64, tpu.core_type = #tpu.core_type<tc>, window_params = [{transform_indices = @transform_0, window_bounds = array<i64: 8, 16>}, {pipeline_mode = #tpu.pipeline_mode<synchronous>, transform_indices = @transform_1, window_bounds = array<i64: 24, 32>}, {pipeline_mode = #tpu.pipeline_mode<synchronous>, transform_indices = @transform_2, window_bounds = array<i64: 40, 32>}, {pipeline_mode = #tpu.pipeline_mode<synchronous>, transform_indices = @transform_3, window_bounds = array<i64: 40, 128>}, {transform_indices = @transform_4, window_bounds = array<i64: 8, 128>}]} {
    %c0 = arith.constant 0 : index
    %c0_0 = arith.constant 0 : index
    %0 = vector.load %arg1[%c0, %c0_0] : memref<8x16xf32, #tpu.memory_space<vmem>>, vector<8x16xf32>
    %c0_1 = arith.constant 0 : index
    %c0_2 = arith.constant 0 : index
    %1 = vector.load %arg2[%c0_1, %c0_2] : memref<24x32xf32, #tpu.memory_space<vmem>>, vector<16x32xf32>
    %c16 = arith.constant 16 : index
    %c0_3 = arith.constant 0 : index
    %2 = vector.load %arg2[%c16, %c0_3] : memref<24x32xf32, #tpu.memory_space<vmem>>, vector<1x32xf32>
    %cst = arith.constant dense<0.000000e+00> : vector<8x32xf32>
    %3 = tpu.matmul %0, %1, %cst {dimension_numbers = #tpu.dot_dimension_numbers<[1], [0], [0], [1], [0, 0, 1, 1], [], []>} : vector<8x16xf32>, vector<16x32xf32>, vector<8x32xf32> -> vector<8x32xf32>
    %4 = vector.broadcast %2 : vector<1x32xf32> to vector<8x32xf32>
    %5 = arith.addf %3, %4 : vector<8x32xf32>
    %cst_4 = arith.constant 0.000000e+00 : f32
    %6 = vector.broadcast %cst_4 : f32 to vector<8x32xf32>
    %7 = arith.maximumf %5, %6 : vector<8x32xf32>
    %c0_5 = arith.constant 0 : index
    %c0_6 = arith.constant 0 : index
    %8 = vector.load %arg3[%c0_5, %c0_6] : memref<40x32xf32, #tpu.memory_space<vmem>>, vector<32x32xf32>
    %c32 = arith.constant 32 : index
    %c0_7 = arith.constant 0 : index
    %9 = vector.load %arg3[%c32, %c0_7] : memref<40x32xf32, #tpu.memory_space<vmem>>, vector<1x32xf32>
    %cst_8 = arith.constant dense<0.000000e+00> : vector<8x32xf32>
    %10 = tpu.matmul %7, %8, %cst_8 {dimension_numbers = #tpu.dot_dimension_numbers<[1], [0], [0], [1], [0, 0, 1, 1], [], []>} : vector<8x32xf32>, vector<32x32xf32>, vector<8x32xf32> -> vector<8x32xf32>
    %11 = vector.broadcast %9 : vector<1x32xf32> to vector<8x32xf32>
    %12 = arith.addf %10, %11 : vector<8x32xf32>
    %cst_9 = arith.constant 0.000000e+00 : f32
    %13 = vector.broadcast %cst_9 : f32 to vector<8x32xf32>
    %14 = arith.maximumf %12, %13 : vector<8x32xf32>
    %c0_10 = arith.constant 0 : index
    %c0_11 = arith.constant 0 : index
    %15 = vector.load %arg4[%c0_10, %c0_11] : memref<40x128xf32, #tpu.memory_space<vmem>>, vector<32x128xf32>
    %c32_12 = arith.constant 32 : index
    %c0_13 = arith.constant 0 : index
    %16 = vector.load %arg4[%c32_12, %c0_13] : memref<40x128xf32, #tpu.memory_space<vmem>>, vector<1x128xf32>
    %cst_14 = arith.constant dense<0.000000e+00> : vector<8x128xf32>
    %17 = tpu.matmul %14, %15, %cst_14 {dimension_numbers = #tpu.dot_dimension_numbers<[1], [0], [0], [1], [0, 0, 1, 1], [], []>} : vector<8x32xf32>, vector<32x128xf32>, vector<8x128xf32> -> vector<8x128xf32>
    %18 = vector.broadcast %16 : vector<1x128xf32> to vector<8x128xf32>
    %19 = arith.addf %17, %18 : vector<8x128xf32>
    %20 = tpu.iota {dimensions = array<i32: 1>} : vector<8x128xi32>
    %c8_i32 = arith.constant 8 : i32
    %21 = vector.broadcast %c8_i32 : i32 to vector<8x128xi32>
    %22 = arith.cmpi slt, %20, %21 : vector<8x128xi32>
    %cst_15 = arith.constant 0xFF800000 : f32
    %23 = vector.broadcast %cst_15 : f32 to vector<8x128xf32>
    %24 = arith.select %22, %19, %23 : vector<8x128xi1>, vector<8x128xf32>
    %cst_16 = arith.constant dense<0xFF800000> : vector<8xf32>
    %25 = vector.multi_reduction <maximumf>, %24, %cst_16 [1] : vector<8x128xf32> to vector<8xf32>
    %26 = vector.shape_cast %25 : vector<8xf32> to vector<8x1xf32>
    %27 = vector.broadcast %26 : vector<8x1xf32> to vector<8x128xf32>
    %28 = arith.subf %24, %27 : vector<8x128xf32>
    %29 = math.exp %28 : vector<8x128xf32>
    %cst_17 = arith.constant dense<0.000000e+00> : vector<8xf32>
    %30 = vector.multi_reduction <add>, %29, %cst_17 [1] : vector<8x128xf32> to vector<8xf32>
    %31 = vector.shape_cast %30 : vector<8xf32> to vector<8x1xf32>
    %32 = tpu.reciprocal %31 : vector<8x1xf32> -> vector<8x1xf32>
    %33 = vector.broadcast %32 : vector<8x1xf32> to vector<8x128xf32>
    %34 = arith.mulf %29, %33 : vector<8x128xf32>
    %c8_i32_18 = arith.constant 8 : i32
    %35 = vector.broadcast %c8_i32_18 : i32 to vector<8x128xi32>
    %36 = arith.cmpi eq, %20, %35 : vector<8x128xi32>
    %37 = arith.select %36, %19, %34 : vector<8x128xi1>, vector<8x128xf32>
    %c0_19 = arith.constant 0 : index
    %c0_20 = arith.constant 0 : index
    %38 = vector.load %arg5[%c0_19, %c0_20] : memref<8x128xf32, #tpu.memory_space<vmem>>, vector<8x128xf32>
    tpu.vector_store %arg5[%c0_19, %c0_20], %37 {strides = array<i32>} : memref<8x128xf32, #tpu.memory_space<vmem>>, vector<8x128xf32>,
    return
  }
  func.func @transform_0(%arg0: i32) -> (i32, i32) {
    %c0_i32 = arith.constant 0 : i32
    %c0_i32_0 = arith.constant 0 : i32
    return %arg0, %c0_i32 : i32, i32
  }
  func.func @transform_1(%arg0: i32) -> (i32, i32) {
    %c0_i32 = arith.constant 0 : i32
    %c0_i32_0 = arith.constant 0 : i32
    %c0_i32_1 = arith.constant 0 : i32
    return %c0_i32, %c0_i32_0 : i32, i32
  }
  func.func @transform_2(%arg0: i32) -> (i32, i32) {
    %c0_i32 = arith.constant 0 : i32
    %c0_i32_0 = arith.constant 0 : i32
    %c0_i32_1 = arith.constant 0 : i32
    return %c0_i32, %c0_i32_0 : i32, i32
  }
  func.func @transform_3(%arg0: i32) -> (i32, i32) {
    %c0_i32 = arith.constant 0 : i32
    %c0_i32_0 = arith.constant 0 : i32
    %c0_i32_1 = arith.constant 0 : i32
    return %c0_i32, %c0_i32_0 : i32, i32
  }
  func.func @transform_4(%arg0: i32) -> (i32, i32) {
    %c0_i32 = arith.constant 0 : i32
    %c0_i32_0 = arith.constant 0 : i32
    return %arg0, %c0_i32 : i32, i32
  }
}

</mosaic_0001>

<bundles_post_ra>
// kernel: tpu_custom_call.1
= control target key start
LH: loop header
LB: loop body
LE: loop exit
PB: predicated region body
PF: predicated region fallthrough
CT: control target
= control target key end

     0   :  { %v392_v2 = vmov 0.0|0.0   ;;  %vm393_vm0 = vmmov 0   ;;  %v394_v4 = vmov 0.0   ;;  %s478_s0 = inlined_call_operand.vmem [shape: f32[8,16], index: 0, kind: input, shape index: {}]   ;;  %s479_s1 = inlined_call_operand.vmem [shape: f32[24,32], index: 1, kind: input, shape index: {}]   ;;  %s480_s2 = inlined_call_operand.vmem [shape: f32[40,32], index: 2, kind: input, shape index: {}]   ;;  %s481_s3 = inlined_call_operand.vmem [shape: f32[40,128], index: 3, kind: input, shape index: {}]   ;;  %s482_s4 = inlined_call_operand.hbm [shape: f32[8,128], index: 4, kind: output, shape index: {}]  }
   0x1   :  { %v19_v0 = vld [vmem:[%s479_s1] sm:$0xff]  ;;  %v20_v1 = vld [vmem:[%s479_s1 + $0x8] sm:$0xff]  ;;  %345 = vmatprep.subr.bf16.mxu0 %v392_v2  ;;  %320 = vmatprep.mubr.msk.f32.mxu0 %vm393_vm0, %v394_v4 }
   0x2   :  { %v346_v3 = vpack.c.bf16 %v20_v1, %v19_v0  ;;  %v101_v5 = vld [vmem:[%s480_s2] sm:$0xff]  ;;  %v102_v6 = vld [vmem:[%s480_s2 + $0x8] sm:$0xff]  ;;  %348 = vmatprep.subr.bf16.mxu1 %v392_v2  ;;  %331 = vmatprep.mubr.msk.f32.mxu1 %vm393_vm0, %v394_v4 }
   0x3   :  { %v349_v7 = vpack.c.bf16 %v102_v6, %v101_v5 }
   0x4   :  { %9 = vsyncpa [#allocation3], 0  ;;  %347 = vmatpush3.bf16.msra.mxu0 %v346_v3  ;;  %v18_v8 = vld [vmem:[%s478_s0] sm:$0xff]  ;;  %vm26_vm1 = vcmask 130048   ;;  %v103_v9 = vld [vmem:[%s480_s2 + $0x10] sm:$0xff]  ;;  %vm110_vm2 = vcmask 261120   ;;  %v267_v28 = vlaneseq }
   0x5   :  { %350 = vmatpush3.bf16.msra.mxu1 %v349_v7  ;;  %354 = vmatprep.subr.bf16.mxu0 %v392_v2  ;;  %v104_v10 = vld [vmem:[%s480_s2 + $0x18] sm:$0xff]  ;;  %v185_v12 = vld [vmem:[%s481_s3] sm:$0xff]  ;;  %v186_v13 = vld [vmem:[%s481_s3 + $0x8] sm:$0xff] }
   0x6   :  { %351 = vmatprep.subr.bf16.mxu1 %v392_v2  ;;  %v352_v11 = vpack.c.bf16 %v104_v10, %v103_v9  ;;  %v355_v14 = vpack.c.bf16 %v186_v13, %v185_v12  ;;  %v297_v15 = vld [vmem:[%s479_s1 + $0x10] ss:$0 sm:$0xff]  ;;  %v188_v21 = vld [vmem:[%s481_s3 + $0x18] sm:$0xff]  ;;  %v299_v23 = vld [vmem:[%s480_s2 + $0x20] ss:$0 sm:$0xff]  ;;  %v268_v29 = vand.u32 127, %v267_v28 }
   0x7   :  { %321 = vmatmul.mubr.msk.f32.vlgmr.msra.gmra.mrb[0].mxu0 %vm26_vm1, %v18_v8  ;;  %v187_v20 = vld [vmem:[%s481_s3 + $0x10] sm:$0xff]  ;;  %v301_v30 = vld [vmem:[%s481_s3 + $0x20] ss:$0 sm:$0xff]  ;;  %s395_s2 = smov [#allocation2]  }
   0x8   :  { %342 = vmatprep.mubr.msk.f32.mxu0 %vm393_vm0, %v394_v4  ;;  %356 = vmatpush3.bf16.msra.mxu0 %v355_v14  ;;  %v358_v22 = vpack.c.bf16 %v188_v21, %v187_v20  ;;  %vm269_vm3 = vcmp.lt.s32.totalorder %v268_v29, 8  ;;  %s289_s15 = sshll.u32 %s395_s2, 4  ;;  %vm280_vm4 = vcmp.eq.s32.totalorder %v268_v29, 8  ;;  %s290_s15 = int_to_ptr.vmem [resolvable:$true] %s289_s15 }
   0x9   :  { %353 = vmatpush3.bf16.msra.mxu1 %v352_v11  ;;  %357 = vmatprep.subr.bf16.mxu0 %v392_v2  ;;  %s368_s3 = scalar_lea.vmem %s290_s15, 128  ;;  %p373_p1 = scmp.lt.s32.totalorder %s290_s15, %s290_s15 }
   0xa   :  { %p369_p0 = scmp.ne.s32.totalorder %s290_s15, %s368_s3  ;;  %p374_p2 = scmp.lt.s32.totalorder %s368_s3, %s368_s3 }
   0xc   :  { %359 = vmatpush3.bf16.msra.mxu0 %v358_v22  ;;  %p375_p3 = por %p374_p2, %p373_p1 }
   0xe   :  { %p376_p4 = pnand %p375_p3, %p369_p0 }
  0xda   :  { %v96_v16 = vpop.f32.mrb[0].mxu0 }
  0xdb   :  { %v97_v17 = vadd.f32 %v297_v15, %v96_v16  ;;  %v322_v18 = vpop.f32.mrb[1].mxu0 }
  0xdd   :  { %v100_v19 = vmax.f32 %v97_v17, 0.0 }
  0xdf   :  { %332 = vmatmul.mubr.msk.f32.vlgmr.msra.gmra.mrb[0].mxu1 %vm110_vm2, %v100_v19 }
 0x1b2   :  { %v180_v24 = vpop.f32.mrb[0].mxu1 }
 0x1b3   :  { %v181_v25 = vadd.f32 %v299_v23, %v180_v24  ;;  %v333_v26 = vpop.f32.mrb[1].mxu1 }
 0x1b5   :  { %v184_v27 = vmax.f32 %v181_v25, 0.0 }
 0x1b7   :  { %343 = vmatmul.mubr.msk.f32.vlgmr.msra.gmra.mrb[2].mxu0 %vm110_vm2, %v184_v27 }
 0x28a   :  { %v263_v31 = vpop.f32.mrb[2].mxu0 }
 0x28b   :  { %v264_v32 = vadd.f32 %v301_v30, %v263_v31  ;;  %v344_v33 = vpop.f32.mrb[3].mxu0 }
 0x28d   :  { %v270_v34 = vsel %vm269_vm3, %v264_v32, -inf }
 0x28e   :  { %271 = vmax.xlane.f32.xlu0 %v270_v34 }
 0x31b   :  { %v272_v35 = vpop.xlane.xlu0 %271 }
 0x31c   :  { %v273_v36 = vsub.f32 %v270_v34, %v272_v35 }
 0x31e   :  { %v274_v37 = vmul.f32 1.442695, %v273_v36 }
 0x320   :  { %364 = vpow2.f32 %v274_v37 }
 0x32a   :  { %v365_v38 = vpop.eup %364 }
 0x32b   :  { %276 = vadd.xlane.f32.xlu0 %v365_v38 }
 0x3b8   :  { %v277_v39 = vpop.xlane.xlu0 %276 }
 0x3b9   :  { %366 = vrcp.f32 %v277_v39 }
 0x3c3   :  { %v367_v40 = vpop.eup %366 }
 0x3c4   :  { %v279_v41 = vmul.f32 %v367_v40, %v365_v38 }
 0x3c6   :  { %v281_v42 = vsel %vm280_vm4, %v264_v32, %v279_v41 }
 0x3c7   :  { %282 = vst [vmem:[#allocation2] sm:$0xff] %v281_v42 }
 0x3c8   :  { %379 = shalt.err (!%p376_p4)
}
 0x3c9   :  { %s380_s18 = scalar_lea.hbm %s482_s4, 128 }
 0x3ca   :  { %p381_p5 = scmp.ne.s32.totalorder %s482_s4, %s380_s18  ;;  %p384_p6 = scmp.lt.u32.totalorder %s380_s18, %s482_s4 }
 0x3cc   :  { %p386_p7 = pnand %p384_p6, %p381_p5 }
 0x3ce   :  { %389 = shalt.err (!%p386_p7)
}
 0x3cf   :  { %292 = dma.vmem_to_hbm [thread:$0]  %s290_s15, 128, %s482_s4, [#allocation3]  }
 0x3d0   :  { %390 = dma.done.wait [#allocation3], 128  }
 0x3d1   :  { %391 = vsyncadd [#allocation3], 4294967168 }
 0x3d2   :  { %296 = vsyncpa [#allocation3], 1 }

</bundles_post_ra>
